<compile_context>
chip_gen: v7x
topology: tpu7x:2x2x1
jax: 0.10.0
libtpu: 0.0.40
codegen_flags: <defaults>
</compile_context>

<pallas_src>
import jax
import jax.numpy as jnp
from jax import lax
from jax.experimental import pallas as pl
from jax.experimental.pallas import tpu as pltpu


# ----------------------------------------------------------------------------
# Kernel
# ----------------------------------------------------------------------------
def _temporal_attention_kernel(z_ref, w_ref, o_ref):
    # z_ref: (bb, T, D) batch block; w_ref: (D, D) torch Linear weight;
    # o_ref: (1, bb, D) output block.
    bb, T, D = z_ref.shape
    f32 = jnp.float32

    z = z_ref[...]                                       # (bb, T, D)
    w = w_ref[...]                                       # (D, D)
    z_last = z_ref[:, T - 1, :]                          # (bb, D)

    # h[b,t] = W z[b,t]  =>  scores[b,t] = h[b,t]·h[b,-1] = z[b,t]·(Wᵀ W z[b,-1]).
    # Two skinny MXU matmuls (f32 accumulation) instead of the full Linear;
    # the f32 h tile is never materialized.
    u = lax.dot_general(z_last, w, (((1,), (1,)), ((), ())),
                        preferred_element_type=f32)      # (bb, D) = h[:, -1, :]
    g = lax.dot_general(u, w, (((1,), (0,)), ((), ())),
                        preferred_element_type=f32)      # (bb, D) = Wᵀ W z_last

    # Attention logits: VPU multiply + XLU lane reduce against z (already in
    # VMEM); a (T, D)x(D, 1) MXU matmul would waste nearly the whole array.
    scores = jnp.sum(z * g[:, None, :], axis=-1, keepdims=True)   # (bb, T, 1) f32

    # Max-subtracted softmax over time (f32).
    m = jnp.max(scores, axis=1, keepdims=True)           # (bb, 1, 1)
    e = jnp.exp(scores - m)                              # (bb, T, 1)
    denom = jnp.sum(e, axis=1)                           # (bb, 1)

    # output[b] = (sum_t e[b,t] * z[b,t,:]) / denom[b]
    # Normalization folded into a single (bb, D) scale.  pl.reciprocal kept
    # exact (approx=True -> EUP slot) to hold the 1e-4 reference tolerance.
    acc = jnp.sum(e * z, axis=1)                         # (bb, D) f32
    inv = pl.reciprocal(denom)                           # (bb, 1)
    o_ref[...] = (acc * inv)[None].astype(o_ref.dtype)   # (1, bb, D)


# ----------------------------------------------------------------------------
# Block sizing (generation-aware, VMEM-driven)
# ----------------------------------------------------------------------------
def _vmem_capacity_bytes():
    """Physical VMEM per TensorCore; conservative fallback if unqueryable."""
    try:
        cap = int(getattr(pltpu.get_tpu_info(), "vmem_capacity_bytes", 0) or 0)
        if cap > 0:
            return cap
    except Exception:
        pass
    return 64 << 20          # v7x per-TC VMEM; safe lower bound for v5e/v6e too


def _is_multicore_chip():
    """True on chips that shard a 'parallel' grid axis across 2 TCs (v7x)."""
    try:
        kind = (jax.devices()[0].device_kind or "").lower()
    except Exception:
        return False
    return ("v7" in kind) or ("7x" in kind)


def _estimate_step_vmem(bb, T, D, z_itemsize, out_itemsize):
    """Per-grid-step VMEM: pipelined buffers + in-kernel f32 temporaries."""
    f32 = 4
    z_block = bb * T * D * z_itemsize
    return (2 * z_block                      # double-buffered z input block
            + 2 * bb * T * D * f32           # f32 (bb,T,D) temps: z*g and e*z
            + 2 * D * D * z_itemsize         # double-buffered W
            + 2 * bb * D * out_itemsize      # double-buffered output block
            + 6 * bb * D * f32               # u, g, acc, out row temps
            + 4 * bb * T * f32               # scores / e / softmax stats
            + (1 << 20))                     # fixed slack


def _pick_block_b(B, T, D, z_itemsize, out_itemsize, *, multi_core):
    """Largest divisor of B whose per-step VMEM fits a generation-aware budget.

    The kernel is HBM-bandwidth bound, so blocks are sized by VMEM (multi-MiB
    z tiles amortize the ~0.35 us/step grid overhead), not by MXU tile shape.
    """
    cap = _vmem_capacity_bytes()
    budget = min(int(cap * 0.6), 48 << 20)   # ~38 MiB on v7x (64 MiB/TC), 48 MiB on v5e/v6e

    divisors = [d for d in range(1, B + 1) if B % d == 0]
    fitting = [d for d in divisors
               if _estimate_step_vmem(d, T, D, z_itemsize, out_itemsize) <= budget]
    if not fitting:
        fitting = [1]
    best = max(fitting)
    if multi_core:
        # v7x: prefer an even number of grid steps (>= 2) so the two
        # TensorCores split the 'parallel' batch axis without a 2:1 imbalance.
        even = [d for d in fitting if (B // d) >= 2 and (B // d) % 2 == 0]
        if even:
            best = max(even)
    return best


# ----------------------------------------------------------------------------
# Wrapper
# ----------------------------------------------------------------------------
def temporal_attention(z, w, *, block_b=None):
    """z: (B, T, D); w: (D, D) Linear weight (PyTorch layout). Returns (B, D)."""
    B, T, D = z.shape
    assert w.shape == (D, D)
    z_item = jnp.dtype(z.dtype).itemsize
    out_dtype = z.dtype
    out_item = jnp.dtype(out_dtype).itemsize

    multi_core = _is_multicore_chip()
    if block_b is None:
        block_b = _pick_block_b(B, T, D, z_item, out_item, multi_core=multi_core)
    assert B % block_b == 0, "block_b must divide B"
    num_blocks = B // block_b

    # Explicit scoped-VMEM limit so the VMEM-sized blocks are actually allowed
    # (defaults are 16 MiB v5e / 32 MiB v6e+), with headroom, capped well below
    # physical capacity.
    cap = _vmem_capacity_bytes()
    est = _estimate_step_vmem(block_b, T, D, z_item, out_item)
    vmem_limit = int(min(int(cap * 0.85), max(32 << 20, 2 * est)))
    vmem_limit = max(vmem_limit, est + (2 << 20))

    cost = pl.CostEstimate(
        flops=4 * B * D * D + 4 * B * T * D,
        transcendentals=B * T,
        bytes_accessed=(B * T * D + D * D) * z_item + B * D * out_item,
    )

    out3 = pl.pallas_call(
        _temporal_attention_kernel,
        out_shape=jax.ShapeDtypeStruct((num_blocks, block_b, D), out_dtype),
        grid_spec=pltpu.PrefetchScalarGridSpec(
            num_scalar_prefetch=0,
            grid=(num_blocks,),
            in_specs=[
                pl.BlockSpec((block_b, T, D), lambda b: (b, 0, 0)),   # z block
                pl.BlockSpec((D, D), lambda b: (0, 0)),               # shared W
            ],
            out_specs=pl.BlockSpec((1, block_b, D), lambda b: (b, 0, 0)),
        ),
        compiler_params=pltpu.CompilerParams(
            dimension_semantics=("parallel",),
            vmem_limit_bytes=vmem_limit,
        ),
        cost_estimate=cost,
    )(z, w)
    return out3.reshape(B, D)


# ----------------------------------------------------------------------------
# Pure-JAX reference (matches the PyTorch forward exactly, f32 math)
# ----------------------------------------------------------------------------
def temporal_attention_ref(z, w):
    h = jnp.einsum("btd,ed->bte", z, w, precision="highest")   # Linear: z @ W.T
    q = h[:, -1, :][..., None]                                  # (B, D, 1)
    lam = jnp.matmul(h, q, precision="highest")[..., 0]         # (B, T)
    lam = jax.nn.softmax(lam, axis=1)[:, None, :]               # (B, 1, T)
    out = jnp.matmul(lam, z, precision="highest")[:, 0, :]      # (B, D)
    return out


if __name__ == "__main__":
    key = jax.random.PRNGKey(0)

    # (1) small shapes consistent with the module; (2) an MXU/lane-friendly
    # config that exercises batch fusion and 128-wide lane-dense stores.
    for (B, T, D) in [(2, 8, 32), (8, 32, 128)]:
        key, kz, kw = jax.random.split(key, 3)
        z = jax.random.normal(kz, (B, T, D), dtype=jnp.float32)
        bound = 1.0 / (D ** 0.5)                 # nn.Linear kaiming-uniform bound
        w = jax.random.uniform(kw, (D, D), minval=-bound, maxval=bound,
                               dtype=jnp.float32)

        out = jax.block_until_ready(temporal_attention(z, w))
        ref = temporal_attention_ref(z, w)
        assert out.shape == (B, D)
        assert jnp.allclose(out, ref, atol=1e-4, rtol=1e-4), \
            f"mismatch vs reference at shape {(B, T, D)}"

    print("KERNEL_OK")
</pallas_src>

<mosaic_0001>
module attributes {stable_mosaic.version = 11 : i64} {
  func.func @_temporal_attention_kernel(%arg0: i32, %arg1: memref<2x8x32xf32, #tpu.memory_space<vmem>>, %arg2: memref<32x32xf32, #tpu.memory_space<vmem>>, %arg3: memref<1x2x32xf32, #tpu.memory_space<vmem>>) attributes {dimension_semantics = [#tpu.dimension_semantics<parallel>], iteration_bounds = array<i64: 1>, scalar_prefetch = 0 : i64, scratch_operands = 0 : i64, tpu.core_type = #tpu.core_type<tc>, window_params = [{transform_indices = @transform_0, window_bounds = array<i64: 2, 8, 32>}, {pipeline_mode = #tpu.pipeline_mode<synchronous>, transform_indices = @transform_1, window_bounds = array<i64: 32, 32>}, {transform_indices = @transform_2, window_bounds = array<i64: 1, 2, 32>}]} {
    %c0 = arith.constant 0 : index
    %c0_0 = arith.constant 0 : index
    %c0_1 = arith.constant 0 : index
    %0 = vector.load %arg1[%c0, %c0_0, %c0_1] : memref<2x8x32xf32, #tpu.memory_space<vmem>>, vector<2x8x32xf32>
    %c0_2 = arith.constant 0 : index
    %c0_3 = arith.constant 0 : index
    %1 = vector.load %arg2[%c0_2, %c0_3] : memref<32x32xf32, #tpu.memory_space<vmem>>, vector<32x32xf32>
    %c0_4 = arith.constant 0 : index
    %c7 = arith.constant 7 : index
    %c0_5 = arith.constant 0 : index
    %2 = vector.load %arg1[%c0_4, %c7, %c0_5] : memref<2x8x32xf32, #tpu.memory_space<vmem>>, vector<2x1x32xf32>
    %3 = vector.shape_cast %2 : vector<2x1x32xf32> to vector<2x32xf32>
    %cst = arith.constant dense<0.000000e+00> : vector<2x32xf32>
    %4 = tpu.matmul %3, %1, %cst {dimension_numbers = #tpu.dot_dimension_numbers<[1], [1], [0], [0], [0, 0, 1, 0], [], []>} : vector<2x32xf32>, vector<32x32xf32>, vector<2x32xf32> -> vector<2x32xf32>
    %cst_6 = arith.constant dense<0.000000e+00> : vector<2x32xf32>
    %5 = tpu.matmul %4, %1, %cst_6 {dimension_numbers = #tpu.dot_dimension_numbers<[1], [0], [0], [1], [0, 0, 1, 1], [], []>} : vector<2x32xf32>, vector<32x32xf32>, vector<2x32xf32> -> vector<2x32xf32>
    %6 = vector.shape_cast %5 : vector<2x32xf32> to vector<2x1x32xf32>
    %7 = vector.broadcast %6 : vector<2x1x32xf32> to vector<2x8x32xf32>
    %8 = arith.mulf %0, %7 : vector<2x8x32xf32>
    %cst_7 = arith.constant dense<0.000000e+00> : vector<2x8xf32>
    %9 = vector.multi_reduction <add>, %8, %cst_7 [2] : vector<2x8x32xf32> to vector<2x8xf32>
    %10 = vector.shape_cast %9 : vector<2x8xf32> to vector<2x8x1xf32>
    %cst_8 = arith.constant dense<0xFF800000> : vector<2x1xf32>
    %11 = vector.multi_reduction <maximumf>, %10, %cst_8 [1] : vector<2x8x1xf32> to vector<2x1xf32>
    %12 = vector.shape_cast %11 : vector<2x1xf32> to vector<2x1x1xf32>
    %13 = vector.broadcast %12 : vector<2x1x1xf32> to vector<2x8x1xf32>
    %14 = arith.subf %10, %13 : vector<2x8x1xf32>
    %15 = math.exp %14 : vector<2x8x1xf32>
    %cst_9 = arith.constant dense<0.000000e+00> : vector<2x1xf32>
    %16 = vector.multi_reduction <add>, %15, %cst_9 [1] : vector<2x8x1xf32> to vector<2x1xf32>
    %17 = vector.broadcast %15 : vector<2x8x1xf32> to vector<2x8x32xf32>
    %18 = arith.mulf %17, %0 : vector<2x8x32xf32>
    %cst_10 = arith.constant dense<0.000000e+00> : vector<2x32xf32>
    %19 = vector.multi_reduction <add>, %18, %cst_10 [1] : vector<2x8x32xf32> to vector<2x32xf32>
    %20 = tpu.reciprocal %16 : vector<2x1xf32> -> vector<2x1xf32>
    %21 = vector.broadcast %20 : vector<2x1xf32> to vector<2x32xf32>
    %22 = arith.mulf %19, %21 : vector<2x32xf32>
    %23 = vector.shape_cast %22 : vector<2x32xf32> to vector<1x2x32xf32>
    %c0_11 = arith.constant 0 : index
    %c0_12 = arith.constant 0 : index
    %c0_13 = arith.constant 0 : index
    %24 = vector.load %arg3[%c0_11, %c0_12, %c0_13] : memref<1x2x32xf32, #tpu.memory_space<vmem>>, vector<1x2x32xf32>
    tpu.vector_store %arg3[%c0_11, %c0_12, %c0_13], %23 {strides = array<i32>} : memref<1x2x32xf32, #tpu.memory_space<vmem>>, vector<1x2x32xf32>,
    return
  }
  func.func @transform_0(%arg0: i32) -> (i32, i32, i32) {
    %c0_i32 = arith.constant 0 : i32
    %c0_i32_0 = arith.constant 0 : i32
    %c0_i32_1 = arith.constant 0 : i32
    return %arg0, %c0_i32, %c0_i32_0 : i32, i32, i32
  }
  func.func @transform_1(%arg0: i32) -> (i32, i32) {
    %c0_i32 = arith.constant 0 : i32
    %c0_i32_0 = arith.constant 0 : i32
    %c0_i32_1 = arith.constant 0 : i32
    return %c0_i32, %c0_i32_0 : i32, i32
  }
  func.func @transform_2(%arg0: i32) -> (i32, i32, i32) {
    %c0_i32 = arith.constant 0 : i32
    %c0_i32_0 = arith.constant 0 : i32
    %c0_i32_1 = arith.constant 0 : i32
    return %arg0, %c0_i32, %c0_i32_0 : i32, i32, i32
  }
}

</mosaic_0001>

<bundles_post_ra>
// kernel: tpu_custom_call.1
= control target key start
LH: loop header
LB: loop body
LE: loop exit
PB: predicated region body
PF: predicated region fallthrough
CT: control target
= control target key end

     0   :  { %7 = vsyncpa [#allocation3], 0  ;;  %s535_s0 = inlined_call_operand.hbm [shape: f32[2,8,32], index: 0, kind: input, shape index: {}]   ;;  %s536_s1 = inlined_call_operand.hbm [shape: f32[32,32], index: 1, kind: input, shape index: {}]   ;;  %s537_s2 = inlined_call_operand.hbm [shape: f32[1,2,32], index: 2, kind: output, shape index: {}]  }
   0x1   :  { %8 = vsyncpa [#allocation6], 0 }
   0x2   :  { %9 = vsyncpa [#allocation4], 0  ;;  %s465_s9 = smov [#allocation2]   ;;  %s393_s13 = scalar_lea.hbm %s535_s0, 256 }
   0x3   :  { %s15_s10 = sshll.u32 %s465_s9, 4  ;;  %p394_p0 = scmp.ne.s32.totalorder %s535_s0, %s393_s13  ;;  %s16_s10 = int_to_ptr.vmem [resolvable:$true] %s15_s10 }
   0x4   :  { %p397_p1 = scmp.lt.u32.totalorder %s393_s13, %s535_s0 }
   0x6   :  { %p399_p2 = pnand %p397_p1, %p394_p0 }
   0x8   :  { %402 = shalt.err (!%p399_p2)
}
   0x9   :  { %s403_s18 = scalar_lea.vmem %s16_s10, 256  ;;  %p408_p4 = scmp.lt.s32.totalorder %s16_s10, %s16_s10 }
   0xa   :  { %p404_p3 = scmp.ne.s32.totalorder %s16_s10, %s403_s18  ;;  %p409_p5 = scmp.lt.s32.totalorder %s403_s18, %s403_s18 }
   0xc   :  { %p410_p6 = por %p409_p5, %p408_p4 }
   0xe   :  { %p411_p7 = pnand %p410_p6, %p404_p3 }
  0x10   :  { %414 = shalt.err (!%p411_p7)
}
  0x11   :  { %s466_s19 = smov 128   ;;  %s467_s20 = smov 8  }
  0x12   :  { %21 = dma.hbm_to_vmem [thread:$0]  %s535_s0, 256, %s16_s10, [#allocation3], %s466_s19, %s466_s19, %s467_s20  }
  0x13   :  { %s468_s23 = smov [#allocation5]   ;;  %s415_s27 = scalar_lea.hbm %s536_s1, 512 }
  0x14   :  { %s27_s24 = sshll.u32 %s468_s23, 4  ;;  %p416_p8 = scmp.ne.s32.totalorder %s536_s1, %s415_s27  ;;  %s28_s24 = int_to_ptr.vmem [resolvable:$true] %s27_s24 }
  0x15   :  { %p419_p9 = scmp.lt.u32.totalorder %s415_s27, %s536_s1 }
  0x17   :  { %p421_p10 = pnand %p419_p9, %p416_p8 }
  0x19   :  { %424 = shalt.err (!%p421_p10)
}
  0x1a   :  { %s425_s4 = scalar_lea.vmem %s28_s24, 512  ;;  %p430_p12 = scmp.lt.s32.totalorder %s28_s24, %s28_s24 }
  0x1b   :  { %p426_p11 = scmp.ne.s32.totalorder %s28_s24, %s425_s4  ;;  %p431_p13 = scmp.lt.s32.totalorder %s425_s4, %s425_s4 }
  0x1d   :  { %p432_p0 = por %p431_p13, %p430_p12 }
  0x1f   :  { %p433_p1 = pnand %p432_p0, %p426_p11 }
  0x21   :  { %436 = shalt.err (!%p433_p1)
}
  0x22   :  { %33 = dma.hbm_to_vmem [thread:$0]  %s536_s1, 512, %s28_s24, [#allocation6], %s466_s19, %s466_s19, %s467_s20  }
  0x23   :  { %459 = dma.done.wait [#allocation3], 256  }
  0x24   :  { %460 = vsyncadd [#allocation3], 4294967040 }
  0x25   :  { %461 = dma.done.wait [#allocation6], 512  }
  0x26   :  { %462 = vsyncadd [#allocation6], 4294966784  ;;  %v469_v0 = vmov 0.0|0.0   ;;  %vm470_vm0 = vmmov 0   ;;  %v471_v1 = vmov 0.0   ;;  %vm53_vm1 = vcmask 261120  }
  0x27   :  { %362 = vmatprep.subr.bf16.mxu0 %v469_v0  ;;  %348 = vmatprep.mubr.msk.f32.mxu0 %vm470_vm0, %v471_v1  ;;  %v42_v2 = vld [vmem:[#allocation5] sm:$0xff]  ;;  %v43_v3 = vld [vmem:[#allocation5 + $0x8] sm:$0xff]  ;;  %vm364_vm2 = vmpackc.low %vm53_vm1, %vm53_vm1  ;;  %vm51_vm3 = vcmask 1041409   ;;  %v472_v14 = vmov 1966171168   ;;  %v215_v16 = vlaneseq  ;;  %s473_s1 = smov [#allocation7]  }
  0x28   :  { %370 = vmatprep.subr.bf16.mxu1 %v469_v0  ;;  %359 = vmatprep.mubr.msk.f32.mxu1 %vm470_vm0, %v471_v1  ;;  %v363_v4 = vpack.c.bf16 %v43_v3, %v42_v2  ;;  %v44_v5 = vld [vmem:[#allocation5 + $0x10] sm:$0xff]  ;;  %v45_v6 = vld [vmem:[#allocation5 + $0x18] sm:$0xff]  ;;  %v213_v15 = vunpack.c.l.s4 %v472_v14  ;;  %s314_s6 = sshll.u32 %s473_s1, 4  ;;  %vm306_vm4 = vcmask 254976   ;;  %s315_s6 = int_to_ptr.vmem [resolvable:$true] %s314_s6 }
  0x29   :  { %v367_v7 = vpack.c.bf16 %v45_v6, %v44_v5  ;;  %v47_v8 = vld [vmem:[#allocation2 + $0xf] sm:$0x1]  ;;  %v46_v10 = vld [vmem:[#allocation2 + $0x7] sm:$0x1]  ;;  %v216_v18 = vshrl.u32 %v215_v16, 7  ;;  %s437_s7 = scalar_lea.vmem %s315_s6, 32  ;;  %p442_p3 = scmp.lt.s32.totalorder %s315_s6, %s315_s6 }
  0x2a   :  { %365 = vmatpush3.bf16.xpose.msk.msra.mxu0 %vm364_vm2, %v363_v4  ;;  %372 = vmatpush3.bf16.msra.mxu1 %v363_v4  ;;  %v50_v9 = vrot.slane %v47_v8, 7  ;;  %v214_v17 = vunpack.c.0.s8 %v213_v15  ;;  %v40_v26 = vld [vmem:[#allocation2] sm:$0xff]  ;;  %v41_v29 = vld [vmem:[#allocation2 + $0x8] sm:$0xff]  ;;  %p438_p2 = scmp.ne.s32.totalorder %s315_s6, %s437_s7  ;;  %p443_p4 = scmp.lt.s32.totalorder %s437_s7, %s437_s7 }
  0x2b   :  { %366 = vmatprep.subr.bf16.mxu0 %v469_v0  ;;  %373 = vmatprep.subr.bf16.mxu1 %v469_v0  ;;  %v236_v23 = vsub.s32 0, %v216_v18 }
  0x2c   :  { %v52_v11 = vsel %vm51_vm3, %v50_v9, %v46_v10  ;;  %v217_v19 = vsub.s32 %v214_v17, %v216_v18  ;;  %p444_p5 = por %p443_p4, %p442_p3 }
  0x2e   :  { %375 = vmatpush3.bf16.msra.mxu1 %v367_v7  ;;  %p445_p6 = pnand %p444_p5, %p438_p2 }
  0x32   :  { %369 = vmatpush3.bf16.xpose.msk.msra.mxu0 %vm364_vm2, %v367_v7 }
  0x39   :  { %349 = vmatmul.mubr.msk.f32.vlgmr.msra.gmra.mrb[0].mxu0 %vm53_vm1, %v52_v11 }
 0x10c   :  { %v134_v12 = vpop.f32.mrb[0].mxu0 }
 0x10d   :  { %v350_v13 = vpop.f32.mrb[1].mxu0  ;;  %360 = vmatmul.mubr.msk.f32.vlgmr.msra.gmra.mrb[0].mxu1 %vm53_vm1, %v134_v12 }
 0x1e0   :  { %v207_v20 = vpop.f32.mrb[0].mxu1 }
 0x1e1   :  { %v218_v21 = vrot.slane %v207_v20, %v217_v19  ;;  %v361_v22 = vpop.f32.mrb[1].mxu1 }
 0x1e3   :  { %v219_v24 = vcombine.high %v218_v21, %v218_v21  ;;  %v226_v25 = vrot.slane %v218_v21, %v217_v19 }
 0x1e5   :  { %v233_v27 = vrot.slane %v219_v24, %v217_v19  ;;  %v237_v28 = vrot.slane %v226_v25, %v236_v23 }
 0x1e7   :  { %v244_v30 = vmul.f32 %v237_v28, %v40_v26  ;;  %v241_v31 = vrot.slane %v233_v27, %v236_v23 }
 0x1e9   :  { %v246_v32 = vsel %vm53_vm1, %v244_v30, 0.0  ;;  %v245_v33 = vmul.f32 %v241_v31, %v41_v29 }
 0x1ea   :  { %247 = vadd.xlane.f32.xlu0 %v246_v32 }
 0x1eb   :  { %v249_v34 = vsel %vm53_vm1, %v245_v33, 0.0 }
 0x1ee   :  { %250 = vadd.xlane.f32.xlu0 %v249_v34 }
 0x277   :  { %v248_v35 = vpop.xlane.xlu0 %247 }
 0x278   :  { %v252_v36 = vrot.slane %v248_v35, 4 }
 0x27a   :  { %v253_v37 = vmax.f32 %v248_v35, %v252_v36 }
 0x27b   :  { %v251_v38 = vpop.xlane.xlu0 %250 }
 0x27c   :  { %v254_v39 = vrot.slane %v253_v37, 2  ;;  %v258_v40 = vrot.slane %v251_v38, 4 }
 0x27e   :  { %v255_v41 = vmax.f32 %v253_v37, %v254_v39  ;;  %v259_v42 = vmax.f32 %v251_v38, %v258_v40 }
 0x280   :  { %v256_v43 = vrot.slane %v255_v41, 1  ;;  %v260_v44 = vrot.slane %v259_v42, 2 }
 0x282   :  { %v257_v45 = vmax.f32 %v255_v41, %v256_v43  ;;  %v261_v46 = vmax.f32 %v259_v42, %v260_v44 }
 0x284   :  { %v264_v47 = vsub.f32 %v248_v35, %v257_v45  ;;  %v262_v48 = vrot.slane %v261_v46, 1 }
 0x286   :  { %v266_v49 = vmul.f32 1.442695, %v264_v47  ;;  %v263_v50 = vmax.f32 %v261_v46, %v262_v48 }
 0x288   :  { %385 = vpow2.f32 %v266_v49  ;;  %v265_v51 = vsub.f32 %v251_v38, %v263_v50 }
 0x28a   :  { %v268_v52 = vmul.f32 1.442695, %v265_v51 }
 0x28c   :  { %387 = vpow2.f32 %v268_v52 }
 0x292   :  { %v386_v53 = vpop.eup %385 }
 0x293   :  { %v270_v54 = vrot.slane %v386_v53, 4  ;;  %v282_v55 = vmul.f32 %v386_v53, %v40_v26 }
 0x295   :  { %v271_v56 = vadd.f32 %v386_v53, %v270_v54  ;;  %v284_v57 = vsel %vm53_vm1, %v282_v55, 0.0 }
 0x296   :  { %v388_v58 = vpop.eup %387  ;;  %v285_v62 = vrot.slane %v284_v57, 4 }
 0x297   :  { %v272_v59 = vrot.slane %v271_v56, 2  ;;  %v276_v60 = vrot.slane %v388_v58, 4  ;;  %v283_v61 = vmul.f32 %v388_v58, %v41_v29 }
 0x298   :  { %v286_v5 = vadd.f32 %v285_v62, %v284_v57 }
 0x299   :  { %v273_v63 = vadd.f32 %v272_v59, %v271_v56  ;;  %v277_v0 = vadd.f32 %v388_v58, %v276_v60  ;;  %v291_v1 = vsel %vm53_vm1, %v283_v61, 0.0 }
 0x29a   :  { %v292_v2 = vrot.slane %v291_v1, 4  ;;  %v287_v10 = vrot.slane %v286_v5, 2 }
 0x29b   :  { %v274_v3 = vrot.slane %v273_v63, 1  ;;  %v278_v4 = vrot.slane %v277_v0, 2 }
 0x29c   :  { %v293_v6 = vadd.f32 %v292_v2, %v291_v1  ;;  %v288_v13 = vadd.f32 %v287_v10, %v286_v5 }
 0x29d   :  { %v275_v7 = vadd.f32 %v274_v3, %v273_v63  ;;  %v279_v8 = vadd.f32 %v278_v4, %v277_v0 }
 0x29e   :  { %v294_v11 = vrot.slane %v293_v6, 2  ;;  %v289_v15 = vrot.slane %v288_v13, 1 }
 0x29f   :  { %v280_v9 = vrot.slane %v279_v8, 1  ;;  %389 = vrcp.f32 %v275_v7 }
 0x2a0   :  { %v295_v14 = vadd.f32 %v294_v11, %v293_v6  ;;  %v290_v18 = vadd.f32 %v289_v15, %v288_v13 }
 0x2a1   :  { %v281_v12 = vadd.f32 %v280_v9, %v279_v8 }
 0x2a2   :  { %v296_v16 = vrot.slane %v295_v14, 1 }
 0x2a3   :  { %391 = vrcp.f32 %v281_v12 }
 0x2a4   :  { %v297_v19 = vadd.f32 %v296_v16, %v295_v14 }
 0x2a9   :  { %v390_v17 = vpop.eup %389 }
 0x2aa   :  { %v300_v21 = vmul.f32 %v390_v17, %v290_v18 }
 0x2ad   :  { %v392_v20 = vpop.eup %391 }
 0x2ae   :  { %v301_v22 = vmul.f32 %v392_v20, %v297_v19 }
 0x2b0   :  { %v304_v23 = vsel %vm51_vm3, %v301_v22, %v300_v21 }
 0x2b1   :  { %307 = vst.msk [vmem:[#allocation7] sm:$0x3] %vm306_vm4, %v304_v23 }
 0x2b2   :  { %448 = shalt.err (!%p445_p6)
}
 0x2b3   :  { %s449_s10 = scalar_lea.hbm %s537_s2, 32 }
 0x2b4   :  { %p450_p7 = scmp.ne.s32.totalorder %s537_s2, %s449_s10  ;;  %p453_p8 = scmp.lt.u32.totalorder %s449_s10, %s537_s2 }
 0x2b6   :  { %p455_p9 = pnand %p453_p8, %p450_p7 }
 0x2b8   :  { %458 = shalt.err (!%p455_p9)
}
 0x2b9   :  { %317 = dma.vmem_to_hbm [thread:$0]  %s315_s6, 32, %s537_s2, [#allocation4]  }
 0x2ba   :  { %463 = dma.done.wait [#allocation4], 32  }
 0x2bb   :  { %464 = vsyncadd [#allocation4], 4294967264 }
 0x2bc   :  { %321 = vsyncpa [#allocation3], 1 }
 0x2bd   :  { %322 = vsyncpa [#allocation6], 1 }
 0x2be   :  { %323 = vsyncpa [#allocation4], 1 }

</bundles_post_ra>
